<compile_context>
chip_gen: v7x
topology: tpu7x:2x2x1
jax: 0.10.0
libtpu: 0.0.40
codegen_flags: <defaults>
</compile_context>

<pallas_src>
import functools

import jax
import jax.numpy as jnp
from jax.experimental import pallas as pl
from jax.experimental.pallas import tpu as pltpu


EMBED_DIM = 32
HIDDEN = 64
DEFAULT_TILE_N = 2048
MIN_BLOCKS = 4          # aim for >= 4 grid steps (pipeline ramp-up, 2 TCs on v7x)


def _round_up(x, m):
    return ((x + m - 1) // m) * m


def _camera_embed_kernel(x_ref, small_ref, w2t_ref, w3t_ref, o_ref):
    """One (features, tn) slab of the fused 3-layer MLP, feature-major.

    x_ref     : (4, tn)   rows = phi, theta, rho, ones   (lane-dense along N)
    small_ref : (64, 8)   cols 0:3 = w1^T, col 3 = b1, col 4 = b2,
                          col 5 = b3 (rows 0:embed_dim), cols 6:8 = 0
    w2t_ref   : (64, 64)  = w2^T
    w3t_ref   : (embed_dim, 64) = w3^T
    o_ref     : (embed_dim, tn) lane-dense output block
    """
    embed_dim = o_ref.shape[0]

    x = x_ref[...]                                   # (4, tn)
    w1_aug = small_ref[:, 0:4]                       # (64, 4)  w1^T with b1 folded
    b2 = small_ref[:, 4:5]                           # (64, 1)
    b3 = small_ref[0:embed_dim, 5:6]                 # (embed_dim, 1)

    # Layer 1 on the MXU; b1 is added for free via the constant-ones input row.
    h1 = jnp.dot(w1_aug, x, preferred_element_type=jnp.float32)       # (64, tn)
    h1 = jnp.maximum(h1, 0.0)

    # Layers 2-3, feature-major so the result is naturally (embed_dim, tn).
    h2 = jnp.dot(w2t_ref[...], h1, preferred_element_type=jnp.float32) + b2
    h2 = jnp.maximum(h2, 0.0)
    o_ref[...] = jnp.dot(w3t_ref[...], h2, preferred_element_type=jnp.float32) + b3


def init_params(key, embed_dim=EMBED_DIM):
    """Deterministic init mimicking nn.Linear default (uniform +-1/sqrt(fan_in)).

    Weights stored as (in_features, out_features) (PyTorch W transposed); biases 1-D.
    """
    keys = jax.random.split(key, 6)

    def linear(kw, kb, fan_in, fan_out):
        bound = 1.0 / jnp.sqrt(jnp.float32(fan_in))
        w = jax.random.uniform(kw, (fan_in, fan_out), jnp.float32, -bound, bound)
        b = jax.random.uniform(kb, (fan_out,), jnp.float32, -bound, bound)
        return w, b

    w1, b1 = linear(keys[0], keys[1], 3, HIDDEN)
    w2, b2 = linear(keys[2], keys[3], HIDDEN, HIDDEN)
    w3, b3 = linear(keys[4], keys[5], HIDDEN, embed_dim)
    return (w1, b1, w2, b2, w3, b3)


def pack_params(params, embed_dim=EMBED_DIM):
    """One-time packing into the kernel's feature-major, VMEM-resident operands."""
    w1, b1, w2, b2, w3, b3 = params
    small = jnp.zeros((HIDDEN, 8), jnp.float32)
    small = small.at[:, 0:3].set(w1.T.astype(jnp.float32))      # w1^T : (64, 3)
    small = small.at[:, 3].set(b1.astype(jnp.float32))          # b1 folded into w1_aug
    small = small.at[:, 4].set(b2.astype(jnp.float32))
    small = small.at[:embed_dim, 5].set(b3.astype(jnp.float32))
    w2t = w2.T.astype(jnp.float32)                               # (64, 64)
    w3t = w3.T.astype(jnp.float32)                               # (embed_dim, 64)
    return (small, w2t, w3t)


def _choose_tile_n(n, tile_n):
    """Lane-dim tile along N: multiple of 128 (or the whole axis when N <= 128),
    capped so that the grid has >= MIN_BLOCKS steps whenever N allows it."""
    if n <= 128:
        return n                                  # single full-extent block
    cap = _round_up(pl.cdiv(n, MIN_BLOCKS), 128)  # keep >= MIN_BLOCKS grid steps
    tn = min(tile_n, max(128, cap))
    return max(128, (tn // 128) * 128)            # enforce 128-lane alignment


@functools.partial(jax.jit,
                   static_argnames=("embed_dim", "tile_n", "feature_major_out"))
def camera_embed(phi, theta, rho, packed_params, embed_dim=EMBED_DIM,
                 tile_n=DEFAULT_TILE_N, feature_major_out=False):
    """JAX wrapper.  Builds the (4, N) feature-major slab, runs the kernel over a
    1-D grid of lane-dense (·, tn) blocks, and (by default) transposes the
    (embed_dim, N) result back to the module's (N, embed_dim) layout."""
    small, w2t, w3t = packed_params
    n = phi.shape[0]

    f32 = lambda v: v.astype(jnp.float32)
    ones = jnp.ones((n,), jnp.float32)
    x4 = jnp.stack([f32(phi), f32(theta), f32(rho), ones], axis=0)    # (4, N)

    tn = _choose_tile_n(n, tile_n)
    grid = (pl.cdiv(n, tn),)

    resident = lambda shape: pl.BlockSpec(shape, lambda i: (0, 0))

    out_fm = pl.pallas_call(
        _camera_embed_kernel,
        grid=grid,
        in_specs=[
            pl.BlockSpec((4, tn), lambda i: (0, i)),   # feature-major input tile
            resident(small.shape),                     # packed w1_aug/b1/b2/b3
            resident(w2t.shape),                       # w2^T (VMEM-resident)
            resident(w3t.shape),                       # w3^T (VMEM-resident)
        ],
        out_specs=pl.BlockSpec((embed_dim, tn), lambda i: (0, i)),
        out_shape=jax.ShapeDtypeStruct((embed_dim, n), jnp.float32),
        compiler_params=pltpu.CompilerParams(
            dimension_semantics=("parallel",)),        # v7x: shard grid over 2 TCs
    )(x4, small, w2t, w3t)

    if feature_major_out:
        return out_fm                                  # (embed_dim, N) lane-dense slab
    return out_fm.T                                    # (N, embed_dim) module layout


def camera_embed_ref(phi, theta, rho, params):
    """Pure-JAX reference matching the PyTorch forward exactly."""
    w1, b1, w2, b2, w3, b3 = params
    x = jnp.stack([phi, theta, rho], axis=-1).astype(jnp.float32)     # (N, 3)
    h1 = jnp.maximum(x @ w1 + b1, 0.0)
    h2 = jnp.maximum(h1 @ w2 + b2, 0.0)
    return h2 @ w3 + b3


if __name__ == "__main__":
    key = jax.random.PRNGKey(0)
    k_params, k_phi, k_theta, k_rho = jax.random.split(key, 4)

    params = init_params(k_params, EMBED_DIM)
    packed = pack_params(params, EMBED_DIM)

    # Tolerance: 1e-4 absorbs MXU f32 multi-pass / accumulation-order deltas
    # between the feature-major kernel and the N-major reference (~1e-6 level);
    # a bf16 shortcut (~1e-3) would still fail this check.
    ATOL, RTOL = 1e-4, 1e-4

    # Small case (typical usage of the module): single full-extent block.
    N = 8
    phi = jax.random.uniform(k_phi, (N,), jnp.float32, 0.0, 2.0 * jnp.pi)
    theta = jax.random.uniform(k_theta, (N,), jnp.float32, 0.0, jnp.pi)
    rho = jax.random.uniform(k_rho, (N,), jnp.float32, 1.0, 3.0)

    out = jax.block_until_ready(camera_embed(phi, theta, rho, packed,
                                             embed_dim=EMBED_DIM))
    ref = camera_embed_ref(phi, theta, rho, params)
    assert out.shape == (N, EMBED_DIM), out.shape
    assert jnp.allclose(out, ref, atol=ATOL, rtol=RTOL), "mismatch vs reference (N=8)"

    # Multi-step pipelined case with a ragged tail (200 = 128 + 72): grid=(2,),
    # resident weights, partial last block handled by block-boundary padding.
    N2 = 200
    k2a, k2b, k2c = jax.random.split(jax.random.PRNGKey(1), 3)
    phi2 = jax.random.uniform(k2a, (N2,), jnp.float32, 0.0, 2.0 * jnp.pi)
    theta2 = jax.random.uniform(k2b, (N2,), jnp.float32, 0.0, jnp.pi)
    rho2 = jax.random.uniform(k2c, (N2,), jnp.float32, 1.0, 3.0)

    out2 = jax.block_until_ready(camera_embed(phi2, theta2, rho2, packed,
                                              embed_dim=EMBED_DIM, tile_n=128))
    ref2 = camera_embed_ref(phi2, theta2, rho2, params)
    assert out2.shape == (N2, EMBED_DIM), out2.shape
    assert jnp.allclose(out2, ref2, atol=ATOL, rtol=RTOL), "mismatch vs reference (N=200)"

    # Mid-size case with the default tile policy: grid splits into >= 4 steps
    # (v7x gets both TensorCores busy) and the tail block is ragged.
    N3 = 1000
    k3a, k3b, k3c = jax.random.split(jax.random.PRNGKey(2), 3)
    phi3 = jax.random.uniform(k3a, (N3,), jnp.float32, 0.0, 2.0 * jnp.pi)
    theta3 = jax.random.uniform(k3b, (N3,), jnp.float32, 0.0, jnp.pi)
    rho3 = jax.random.uniform(k3c, (N3,), jnp.float32, 1.0, 3.0)

    out3 = jax.block_until_ready(camera_embed(phi3, theta3, rho3, packed,
                                              embed_dim=EMBED_DIM))
    ref3 = camera_embed_ref(phi3, theta3, rho3, params)
    assert out3.shape == (N3, EMBED_DIM), out3.shape
    assert jnp.allclose(out3, ref3, atol=ATOL, rtol=RTOL), "mismatch vs reference (N=1000)"

    print("KERNEL_OK")
</pallas_src>

<mosaic_0001>
module attributes {stable_mosaic.version = 11 : i64} {
  func.func @_camera_embed_kernel(%arg0: i32, %arg1: memref<4x8xf32, #tpu.memory_space<vmem>>, %arg2: memref<64x8xf32, #tpu.memory_space<vmem>>, %arg3: memref<64x64xf32, #tpu.memory_space<vmem>>, %arg4: memref<32x64xf32, #tpu.memory_space<vmem>>, %arg5: memref<32x8xf32, #tpu.memory_space<vmem>>) attributes {dimension_semantics = [#tpu.dimension_semantics<parallel>], iteration_bounds = array<i64: 1>, scalar_prefetch = 0 : i64, scratch_operands = 0 : i64, tpu.core_type = #tpu.core_type<tc>, window_params = [{transform_indices = @transform_0, window_bounds = array<i64: 4, 8>}, {pipeline_mode = #tpu.pipeline_mode<synchronous>, transform_indices = @transform_1, window_bounds = array<i64: 64, 8>}, {pipeline_mode = #tpu.pipeline_mode<synchronous>, transform_indices = @transform_2, window_bounds = array<i64: 64, 64>}, {pipeline_mode = #tpu.pipeline_mode<synchronous>, transform_indices = @transform_3, window_bounds = array<i64: 32, 64>}, {transform_indices = @transform_4, window_bounds = array<i64: 32, 8>}]} {
    %c0 = arith.constant 0 : index
    %c0_0 = arith.constant 0 : index
    %0 = vector.load %arg1[%c0, %c0_0] : memref<4x8xf32, #tpu.memory_space<vmem>>, vector<4x8xf32>
    %c0_1 = arith.constant 0 : index
    %c0_2 = arith.constant 0 : index
    %1 = vector.load %arg2[%c0_1, %c0_2] : memref<64x8xf32, #tpu.memory_space<vmem>>, vector<64x4xf32>
    %c0_3 = arith.constant 0 : index
    %c4 = arith.constant 4 : index
    %2 = vector.load %arg2[%c0_3, %c4] : memref<64x8xf32, #tpu.memory_space<vmem>>, vector<64x1xf32>
    %c0_4 = arith.constant 0 : index
    %c5 = arith.constant 5 : index
    %3 = vector.load %arg2[%c0_4, %c5] : memref<64x8xf32, #tpu.memory_space<vmem>>, vector<32x1xf32>
    %cst = arith.constant dense<0.000000e+00> : vector<64x8xf32>
    %4 = tpu.matmul %1, %0, %cst {dimension_numbers = #tpu.dot_dimension_numbers<[1], [0], [0], [1], [0, 0, 1, 1], [], []>} : vector<64x4xf32>, vector<4x8xf32>, vector<64x8xf32> -> vector<64x8xf32>
    %cst_5 = arith.constant 0.000000e+00 : f32
    %5 = vector.broadcast %cst_5 : f32 to vector<64x8xf32>
    %6 = arith.maximumf %4, %5 : vector<64x8xf32>
    %c0_6 = arith.constant 0 : index
    %c0_7 = arith.constant 0 : index
    %7 = vector.load %arg3[%c0_6, %c0_7] : memref<64x64xf32, #tpu.memory_space<vmem>>, vector<64x64xf32>
    %cst_8 = arith.constant dense<0.000000e+00> : vector<64x8xf32>
    %8 = tpu.matmul %7, %6, %cst_8 {dimension_numbers = #tpu.dot_dimension_numbers<[1], [0], [0], [1], [0, 0, 1, 1], [], []>} : vector<64x64xf32>, vector<64x8xf32>, vector<64x8xf32> -> vector<64x8xf32>
    %9 = vector.broadcast %2 : vector<64x1xf32> to vector<64x8xf32>
    %10 = arith.addf %8, %9 : vector<64x8xf32>
    %cst_9 = arith.constant 0.000000e+00 : f32
    %11 = vector.broadcast %cst_9 : f32 to vector<64x8xf32>
    %12 = arith.maximumf %10, %11 : vector<64x8xf32>
    %c0_10 = arith.constant 0 : index
    %c0_11 = arith.constant 0 : index
    %13 = vector.load %arg4[%c0_10, %c0_11] : memref<32x64xf32, #tpu.memory_space<vmem>>, vector<32x64xf32>
    %cst_12 = arith.constant dense<0.000000e+00> : vector<32x8xf32>
    %14 = tpu.matmul %13, %12, %cst_12 {dimension_numbers = #tpu.dot_dimension_numbers<[1], [0], [0], [1], [0, 0, 1, 1], [], []>} : vector<32x64xf32>, vector<64x8xf32>, vector<32x8xf32> -> vector<32x8xf32>
    %15 = vector.broadcast %3 : vector<32x1xf32> to vector<32x8xf32>
    %16 = arith.addf %14, %15 : vector<32x8xf32>
    %c0_13 = arith.constant 0 : index
    %c0_14 = arith.constant 0 : index
    %17 = vector.load %arg5[%c0_13, %c0_14] : memref<32x8xf32, #tpu.memory_space<vmem>>, vector<32x8xf32>
    tpu.vector_store %arg5[%c0_13, %c0_14], %16 {strides = array<i32>} : memref<32x8xf32, #tpu.memory_space<vmem>>, vector<32x8xf32>,
    return
  }
  func.func @transform_0(%arg0: i32) -> (i32, i32) {
    %c0_i32 = arith.constant 0 : i32
    %c0_i32_0 = arith.constant 0 : i32
    return %c0_i32, %arg0 : i32, i32
  }
  func.func @transform_1(%arg0: i32) -> (i32, i32) {
    %c0_i32 = arith.constant 0 : i32
    %c0_i32_0 = arith.constant 0 : i32
    %c0_i32_1 = arith.constant 0 : i32
    return %c0_i32, %c0_i32_0 : i32, i32
  }
  func.func @transform_2(%arg0: i32) -> (i32, i32) {
    %c0_i32 = arith.constant 0 : i32
    %c0_i32_0 = arith.constant 0 : i32
    %c0_i32_1 = arith.constant 0 : i32
    return %c0_i32, %c0_i32_0 : i32, i32
  }
  func.func @transform_3(%arg0: i32) -> (i32, i32) {
    %c0_i32 = arith.constant 0 : i32
    %c0_i32_0 = arith.constant 0 : i32
    %c0_i32_1 = arith.constant 0 : i32
    return %c0_i32, %c0_i32_0 : i32, i32
  }
  func.func @transform_4(%arg0: i32) -> (i32, i32) {
    %c0_i32 = arith.constant 0 : i32
    %c0_i32_0 = arith.constant 0 : i32
    return %c0_i32, %arg0 : i32, i32
  }
}

</mosaic_0001>

<bundles_post_ra>
// kernel: camera_embed.1
= control target key start
LH: loop header
LB: loop body
LE: loop exit
PB: predicated region body
PF: predicated region fallthrough
CT: control target
= control target key end

     0   :  { %vm51_vm0 = vcmask 1043456   ;;  %vm26_vm1 = vcmask 31744   ;;  %vm208_vm2 = vcmask 523264   ;;  %v632_v10 = vmov 4   ;;  %s774_s0 = inlined_call_operand.vmem [shape: f32[4,8], index: 0, kind: input, shape index: {}]   ;;  %s775_s1 = inlined_call_operand.vmem [shape: f32[64,8], index: 1, kind: input, shape index: {}]   ;;  %s776_s2 = inlined_call_operand.vmem [shape: f32[64,64], index: 2, kind: input, shape index: {}]   ;;  %s777_s3 = inlined_call_operand.vmem [shape: f32[32,64], index: 3, kind: input, shape index: {}]   ;;  %s778_s4 = inlined_call_operand.vmem [shape: f32[32,8], index: 4, kind: output, shape index: {}]  }
   0x1   :  { %v17_v0 = vld [vmem:[%s774_s0] sm:$0xf]  ;;  %v670_v2 = vld [vmem:[%s775_s1 + $0x8] sm:$0xff]  ;;  %v677_v3 = vld [vmem:[%s775_s1 + $0x10] sm:$0xff]  ;;  %628 = vset.pattern.permute.xlu0 %v632_v10  ;;  %629 = vset.pattern.permute.xlu1 %v632_v10  ;;  %v633_v39 = vmov 5   ;;  %vm463_vm3 = vcmask 64512  }
   0x2   :  { %v665_v1 = vld [vmem:[%s775_s1] sm:$0xff]  ;;  %530 = vmatprep.subr.msk.mxu0 %vm51_vm0, %v17_v0  ;;  %v686_v4 = vld [vmem:[%s775_s1 + $0x18] sm:$0xff]  ;;  %v23_v6 = vld [vmem:[%s775_s1 + $0x28] sm:$0xff]  ;;  %185 = vperm.xlu1 %629, %v677_v3  }
   0x3   :  { %532 = vmatprep.mubr.msk.f32.mxu0 %vm26_vm1, %v665_v1  ;;  %531 = vmatpush3.msk.msra.mxu0 %vm51_vm0, %v17_v0  ;;  %v22_v5 = vld [vmem:[%s775_s1 + $0x20] sm:$0xff]  ;;  %v24_v7 = vld [vmem:[%s775_s1 + $0x30] sm:$0xff]  ;;  %v25_v8 = vld [vmem:[%s775_s1 + $0x38] sm:$0xff] }
   0x4   :  { %533 = vmatmul.mubr.msk.f32.vlgmr.msra.gmra.mrb[0].mxu0 %vm26_vm1, %v670_v2  ;;  %v168_v9 = vld [vmem:[%s776_s2] sm:$0xff]  ;;  %177 = vperm.xlu0 %628, %v665_v1   ;;  %v169_v31 = vld [vmem:[%s776_s2 + $0x8] sm:$0xff]  ;;  %v170_v32 = vld [vmem:[%s776_s2 + $0x10] sm:$0xff] }
   0x5   :  { %535 = vmatprep.mubr.msk.f32.mxu0 %vm26_vm1, %v677_v3  ;;  %560 = vmatprep.mubr.msk.f32.mxu1 %vm208_vm2, %v168_v9  ;;  %v171_v33 = vld [vmem:[%s776_s2 + $0x18] sm:$0xff]  ;;  %v172_v34 = vld [vmem:[%s776_s2 + $0x20] sm:$0xff]  ;;  %v173_v35 = vld [vmem:[%s776_s2 + $0x28] sm:$0xff] }
   0x6   :  { %189 = vperm.xlu1 %629, %v686_v4   ;;  %v174_v36 = vld [vmem:[%s776_s2 + $0x30] sm:$0xff]  ;;  %v175_v37 = vld [vmem:[%s776_s2 + $0x38] sm:$0xff]  ;;  %v346_v38 = vld [vmem:[%s777_s3] sm:$0xff] }
   0x8   :  { %536 = vmatmul.mubr.msk.f32.gmra.mrb[2].mxu0 %vm26_vm1, %v686_v4  ;;  %181 = vperm.xlu0 %628, %v670_v2  }
   0x9   :  { %538 = vmatprep.mubr.msk.f32.mxu0 %vm26_vm1, %v22_v5 }
   0xa   :  { %197 = vperm.xlu1 %629, %v23_v6  }
   0xc   :  { %539 = vmatmul.mubr.msk.f32.gmra.mrb[4].mxu0 %vm26_vm1, %v23_v6  ;;  %193 = vperm.xlu0 %628, %v22_v5  }
   0xd   :  { %541 = vmatprep.mubr.msk.f32.mxu0 %vm26_vm1, %v24_v7 }
   0xe   :  { %205 = vperm.xlu1 %629, %v25_v8  }
  0x10   :  { %542 = vmatmul.mubr.msk.f32.gmra.mrb[6].mxu0 %vm26_vm1, %v25_v8  ;;  %201 = vperm.xlu0 %628, %v24_v7  }
  0x11   :  { %588 = vmatprep.mubr.msk.f32.mxu0 %vm208_vm2, %v346_v38 }
  0x12   :  { %631 = vset.pattern.permute.xlu1 %v633_v39 }
  0x13   :  { %355 = vperm.xlu1 %631, %v670_v2  }
  0x14   :  { %630 = vset.pattern.permute.xlu0 %v633_v39 }
  0x15   :  { %351 = vperm.xlu0 %630, %v665_v1  }
  0x17   :  { %359 = vperm.xlu1 %631, %v677_v3  }
  0x19   :  { %363 = vperm.xlu0 %630, %v686_v4  }
  0x81   :  { %v186_v41 = vpop.permute.xlu1 %185 }
  0x83   :  { %v178_v40 = vpop.permute.xlu0 %177 }
  0x85   :  { %v190_v43 = vpop.permute.xlu1 %189 }
  0x87   :  { %v182_v42 = vpop.permute.xlu0 %181 }
  0x89   :  { %v198_v53 = vpop.permute.xlu1 %197 }
  0x8b   :  { %v194_v56 = vpop.permute.xlu0 %193 }
  0x8d   :  { %v206_v1 = vpop.permute.xlu1 %205 }
  0x8f   :  { %v202_v4 = vpop.permute.xlu0 %201 }
  0xd7   :  { %v534_v11 = vpop.f32.mrb[0].mxu0 }
  0xd8   :  { %v161_v12 = vmax.f32 %v534_v11, 0.0  ;;  %v121_v13 = vpop.f32.mrb[1].mxu0 }
  0xd9   :  { %v160_v14 = vmax.f32 %v121_v13, 0.0  ;;  %v348_v13 = vld [vmem:[%s777_s3 + $0x10] sm:$0xff] }
  0xdb   :  { %v537_v15 = vpop.f32.mrb[2].mxu0  ;;  %v594_v16 = vpack.c.bf16 %v161_v12, %v160_v14  ;;  %v347_v12 = vld [vmem:[%s777_s3 + $0x8] sm:$0xff]  ;;  %v349_v14 = vld [vmem:[%s777_s3 + $0x18] sm:$0xff] }
  0xdc   :  { %v163_v17 = vmax.f32 %v537_v15, 0.0  ;;  %v131_v18 = vpop.f32.mrb[3].mxu0  ;;  %v352_v15 = vpop.permute.xlu0 %351 }
  0xdd   :  { %v162_v19 = vmax.f32 %v131_v18, 0.0  ;;  %595 = vmatprep.subr.bf16.mxu1 %v594_v16 }
  0xde   :  { %597 = vmatpush3.bf16.msra.mxu1 %v594_v16  ;;  %v356_v16 = vpop.permute.xlu1 %355 }
  0xdf   :  { %v598_v20 = vpack.c.bf16 %v163_v17, %v162_v19  ;;  %v540_v21 = vpop.f32.mrb[4].mxu0 }
  0xe0   :  { %v165_v22 = vmax.f32 %v540_v21, 0.0  ;;  %v141_v23 = vpop.f32.mrb[5].mxu0  ;;  %v364_v21 = vpop.permute.xlu0 %363 }
  0xe1   :  { %v164_v24 = vmax.f32 %v141_v23, 0.0  ;;  %599 = vmatprep.subr.bf16.mxu1 %v598_v20 }
  0xe2   :  { %601 = vmatpush3.bf16.msra.mxu1 %v598_v20  ;;  %v360_v23 = vpop.permute.xlu1 %359 }
  0xe3   :  { %v602_v25 = vpack.c.bf16 %v165_v22, %v164_v24  ;;  %v543_v26 = vpop.f32.mrb[6].mxu0 }
  0xe4   :  { %v167_v27 = vmax.f32 %v543_v26, 0.0  ;;  %v151_v28 = vpop.f32.mrb[7].mxu0 }
  0xe5   :  { %v166_v29 = vmax.f32 %v151_v28, 0.0  ;;  %603 = vmatprep.subr.bf16.mxu1 %v602_v25 }
  0xe6   :  { %605 = vmatpush3.bf16.msra.mxu1 %v602_v25 }
  0xe7   :  { %v606_v30 = vpack.c.bf16 %v167_v27, %v166_v29 }
  0xe9   :  { %607 = vmatprep.subr.bf16.mxu1 %v606_v30 }
  0xea   :  { %609 = vmatpush3.bf16.msra.mxu1 %v606_v30 }
  0xed   :  { %561 = vmatmul.mubr.msk.f32.vlgmr.msra.gmra.mrb[0].mxu1 %vm208_vm2, %v169_v31 }
  0xee   :  { %563 = vmatprep.mubr.msk.f32.mxu1 %vm208_vm2, %v170_v32 }
  0xf1   :  { %564 = vmatmul.mubr.msk.f32.gmra.mrb[2].mxu1 %vm208_vm2, %v171_v33 }
  0xf2   :  { %566 = vmatprep.mubr.msk.f32.mxu1 %vm208_vm2, %v172_v34 }
  0xf5   :  { %567 = vmatmul.mubr.msk.f32.gmra.mrb[4].mxu1 %vm208_vm2, %v173_v35 }
  0xf6   :  { %569 = vmatprep.mubr.msk.f32.mxu1 %vm208_vm2, %v174_v36 }
  0xf9   :  { %570 = vmatmul.mubr.msk.f32.gmra.mrb[6].mxu1 %vm208_vm2, %v175_v37 }
 0x1c0   :  { %v562_v44 = vpop.f32.mrb[0].mxu1 }
 0x1c1   :  { %v305_v45 = vadd.f32 %v562_v44, %v182_v42  ;;  %v299_v46 = vpop.f32.mrb[1].mxu1 }
 0x1c2   :  { %v300_v47 = vadd.f32 %v299_v46, %v178_v40 }
 0x1c3   :  { %v339_v48 = vmax.f32 %v305_v45, 0.0 }
 0x1c4   :  { %v338_v49 = vmax.f32 %v300_v47, 0.0  ;;  %v565_v50 = vpop.f32.mrb[2].mxu1 }
 0x1c5   :  { %v315_v51 = vadd.f32 %v565_v50, %v190_v43  ;;  %v309_v52 = vpop.f32.mrb[3].mxu1 }
 0x1c6   :  { %v610_v54 = vpack.c.bf16 %v339_v48, %v338_v49  ;;  %v310_v55 = vadd.f32 %v309_v52, %v186_v41 }
 0x1c7   :  { %v341_v57 = vmax.f32 %v315_v51, 0.0 }
 0x1c8   :  { %v340_v58 = vmax.f32 %v310_v55, 0.0  ;;  %v568_v59 = vpop.f32.mrb[4].mxu1  ;;  %611 = vmatprep.subr.bf16.mxu0 %v610_v54 }
 0x1c9   :  { %v325_v60 = vadd.f32 %v568_v59, %v198_v53  ;;  %v319_v61 = vpop.f32.mrb[5].mxu1  ;;  %613 = vmatpush3.bf16.msra.mxu0 %v610_v54 }
 0x1ca   :  { %v614_v62 = vpack.c.bf16 %v341_v57, %v340_v58  ;;  %v320_v63 = vadd.f32 %v319_v61, %v194_v56 }
 0x1cb   :  { %v343_v0 = vmax.f32 %v325_v60, 0.0 }
 0x1cc   :  { %v342_v2 = vmax.f32 %v320_v63, 0.0  ;;  %v571_v3 = vpop.f32.mrb[6].mxu1  ;;  %615 = vmatprep.subr.bf16.mxu0 %v614_v62 }
 0x1cd   :  { %v335_v5 = vadd.f32 %v571_v3, %v206_v1  ;;  %v329_v6 = vpop.f32.mrb[7].mxu1  ;;  %617 = vmatpush3.bf16.msra.mxu0 %v614_v62 }
 0x1ce   :  { %v618_v7 = vpack.c.bf16 %v343_v0, %v342_v2  ;;  %v330_v8 = vadd.f32 %v329_v6, %v202_v4 }
 0x1cf   :  { %v345_v9 = vmax.f32 %v335_v5, 0.0 }
 0x1d0   :  { %v344_v10 = vmax.f32 %v330_v8, 0.0  ;;  %619 = vmatprep.subr.bf16.mxu0 %v618_v7 }
 0x1d1   :  { %621 = vmatpush3.bf16.msra.mxu0 %v618_v7 }
 0x1d2   :  { %v622_v11 = vpack.c.bf16 %v345_v9, %v344_v10 }
 0x1d4   :  { %623 = vmatprep.subr.bf16.mxu0 %v622_v11 }
 0x1d5   :  { %625 = vmatpush3.bf16.msra.mxu0 %v622_v11 }
 0x1d8   :  { %589 = vmatmul.mubr.msk.f32.vlgmr.msra.gmra.mrb[8].mxu0 %vm208_vm2, %v347_v12 }
 0x1d9   :  { %591 = vmatprep.mubr.msk.f32.mxu0 %vm208_vm2, %v348_v13 }
 0x1dc   :  { %592 = vmatmul.mubr.msk.f32.gmra.mrb[10].mxu0 %vm208_vm2, %v349_v14 }
 0x2ab   :  { %v590_v17 = vpop.f32.mrb[8].mxu0 }
 0x2ac   :  { %v450_v18 = vadd.f32 %v590_v17, %v356_v16  ;;  %v444_v19 = vpop.f32.mrb[9].mxu0 }
 0x2ad   :  { %v445_v20 = vadd.f32 %v444_v19, %v352_v15 }
 0x2ae   :  { %465 = vst.msk [vmem:[%s778_s4 + $0x8] sm:$0xff] %vm463_vm3, %v450_v18 }
 0x2af   :  { %464 = vst.msk [vmem:[%s778_s4] sm:$0xff] %vm463_vm3, %v445_v20  ;;  %v593_v22 = vpop.f32.mrb[10].mxu0 }
 0x2b0   :  { %v460_v24 = vadd.f32 %v593_v22, %v364_v21  ;;  %v454_v25 = vpop.f32.mrb[11].mxu0 }
 0x2b1   :  { %v455_v26 = vadd.f32 %v454_v25, %v360_v23 }
 0x2b2   :  { %467 = vst.msk [vmem:[%s778_s4 + $0x18] sm:$0xff] %vm463_vm3, %v460_v24 }
 0x2b3   :  { %466 = vst.msk [vmem:[%s778_s4 + $0x10] sm:$0xff] %vm463_vm3, %v455_v26 }

</bundles_post_ra>
